<compile_context>
chip_gen: v6e
topology: v6e:2x2x1
jax: 0.10.0
libtpu: 0.0.40
codegen_flags: <defaults>
</compile_context>

<pallas_src>
import jax
import jax.numpy as jnp
from jax.experimental import pallas as pl
from jax.experimental.pallas import tpu as pltpu

LANES = 128  # TPU vreg lane width; every layer is padded to this many columns.


def deeper_nn_kernel(x_ref, w1_ref, b1_ref, w2_ref, b2_ref,
                     w3_ref, b3_ref, w4_ref, b4_ref, o_ref):
    # Cast f32 -> bf16 in-kernel (avoids a separate wrapper-side HBM pass).
    x = x_ref[...].astype(w1_ref.dtype)

    # fc1 + ReLU: (block_b, 68) @ (68, 128) -> (block_b, 128), f32 accumulate.
    h = jnp.dot(x, w1_ref[...], preferred_element_type=jnp.float32)
    h = jnp.maximum(h + b1_ref[...], 0.0)
    # dropout1: identity in eval mode.

    # fc2 + ReLU: padded to (128, 128); padded columns stay exactly 0 post-ReLU.
    h = jnp.dot(h.astype(w2_ref.dtype), w2_ref[...],
                preferred_element_type=jnp.float32)
    h = jnp.maximum(h + b2_ref[...], 0.0)
    # dropout2: identity in eval mode.

    # fc3 + ReLU: padded to (128, 128).
    h = jnp.dot(h.astype(w3_ref.dtype), w3_ref[...],
                preferred_element_type=jnp.float32)
    h = jnp.maximum(h + b3_ref[...], 0.0)

    # fc4: padded to 128 output columns; only column 0 is real.
    z = jnp.dot(h.astype(w4_ref.dtype), w4_ref[...],
                preferred_element_type=jnp.float32)
    z = z + b4_ref[...]                       # (block_b, 128)

    # Lane-dense output: aligned XLU transpose (block_b, 128) -> (128, block_b),
    # keep only the real logit row, sigmoid on the EUP, unmasked (1, block_b)
    # f32 store.  This is the ~128x output-traffic reduction vs the old slab.
    zt = jnp.transpose(z)                     # (128, block_b)
    o_ref[...] = jax.nn.sigmoid(zt[0:1, :])   # (1, block_b)


def _pad2d(a, rows, cols):
    return jnp.pad(a, ((0, rows - a.shape[0]), (0, cols - a.shape[1])))


def _round_up(n, m):
    return ((n + m - 1) // m) * m


def deeper_nn_forward(x, params, *, block_b=2048, use_bf16=True):
    """x: (B, 68) float32.  params: dict of (in,out) weights and (1,out) biases."""
    B, F = x.shape
    assert F == 68

    mxu_dtype = jnp.bfloat16 if use_bf16 else jnp.float32

    # Zero-pad every layer to 128 lanes (free on the MXU, keeps intermediates
    # full (8,128) vregs).  ReLU(0)=0 keeps padded columns exactly zero, so
    # numerics are unchanged.  Biases stay f32 for the VPU.
    w1 = _pad2d(params["w1"], 68, LANES).astype(mxu_dtype)      # (68, 128)
    w2 = _pad2d(params["w2"], LANES, LANES).astype(mxu_dtype)   # (128, 128)
    w3 = _pad2d(params["w3"], LANES, LANES).astype(mxu_dtype)   # (128, 128)
    w4 = _pad2d(params["w4"], LANES, LANES).astype(mxu_dtype)   # (128, 128)
    b1 = _pad2d(params["b1"], 1, LANES).astype(jnp.float32)
    b2 = _pad2d(params["b2"], 1, LANES).astype(jnp.float32)
    b3 = _pad2d(params["b3"], 1, LANES).astype(jnp.float32)
    b4 = _pad2d(params["b4"], 1, LANES).astype(jnp.float32)

    # Clamp the tile so small batches are not over-padded; keep a multiple of
    # 128 for unmasked lane-dense stores and clean MXU tiles.
    block_b = max(128, min(block_b, _round_up(B, 128)))
    num_blocks = pl.cdiv(B, block_b)
    b_pad = num_blocks * block_b

    # x stays f32 (cast happens in-kernel); pad only when the batch is ragged.
    x_p = x if b_pad == B else jnp.pad(x, ((0, b_pad - B), (0, 0)))

    def resident(arr):
        # Constant index map -> the block never changes, so the weights/biases
        # stay resident in VMEM across all grid steps.
        return pl.BlockSpec(arr.shape, lambda i: (0, 0))

    out = pl.pallas_call(
        deeper_nn_kernel,
        out_shape=jax.ShapeDtypeStruct((1, b_pad), jnp.float32),
        grid_spec=pltpu.PrefetchScalarGridSpec(
            num_scalar_prefetch=0,
            grid=(num_blocks,),
            in_specs=[
                pl.BlockSpec((block_b, 68), lambda i: (i, 0)),   # x batch tile
                resident(w1), resident(b1),
                resident(w2), resident(b2),
                resident(w3), resident(b3),
                resident(w4), resident(b4),
            ],
            # Lane-dense (1, block_b) row per grid step.
            out_specs=pl.BlockSpec((1, block_b), lambda i: (0, i)),
        ),
        compiler_params=pltpu.CompilerParams(
            dimension_semantics=("parallel",)),
    )(x_p, w1, b1, w2, b2, w3, b3, w4, b4)

    # Drop batch padding and restore the module's (B, 1) output shape.
    return out[0, :B].reshape(B, 1)


def init_params(key):
    """Deterministic init mimicking PyTorch Linear's U(-1/sqrt(fan_in), +)."""
    dims = [(68, 128), (128, 64), (64, 32), (32, 1)]
    params = {}
    for idx, (fan_in, fan_out) in enumerate(dims, start=1):
        key, kw, kb = jax.random.split(key, 3)
        bound = 1.0 / jnp.sqrt(fan_in)
        params[f"w{idx}"] = jax.random.uniform(
            kw, (fan_in, fan_out), jnp.float32, -bound, bound)
        params[f"b{idx}"] = jax.random.uniform(
            kb, (1, fan_out), jnp.float32, -bound, bound)
    return params


def deeper_nn_ref(x, params):
    """Pure-JAX f32 reference (eval-mode dropout = identity)."""
    h = jax.nn.relu(x @ params["w1"] + params["b1"])
    h = jax.nn.relu(h @ params["w2"] + params["b2"])
    h = jax.nn.relu(h @ params["w3"] + params["b3"])
    return jax.nn.sigmoid(h @ params["w4"] + params["b4"])


if __name__ == "__main__":
    key = jax.random.PRNGKey(0)
    key, kx = jax.random.split(key)

    B = 256  # small demo batch; block_b=128 -> 2 "parallel" grid steps (v7x: both TCs)
    x = jax.random.normal(kx, (B, 68), jnp.float32)
    params = init_params(key)

    out = deeper_nn_forward(x, params, block_b=128)
    out = jax.block_until_ready(out)

    ref = deeper_nn_ref(x, params)
    assert out.shape == (B, 1), out.shape
    # bf16 MXU operands -> loosened tolerance vs the pure-f32 reference.
    max_err = float(jnp.max(jnp.abs(out - ref)))
    assert jnp.allclose(out, ref, atol=2e-2, rtol=0.0), max_err

    print("KERNEL_OK")
</pallas_src>

<mosaic_0001>
module attributes {stable_mosaic.version = 11 : i64} {
  func.func @deeper_nn_kernel(%arg0: i32, %arg1: memref<128x68xf32, #tpu.memory_space<vmem>>, %arg2: memref<68x128xbf16, #tpu.memory_space<vmem>>, %arg3: memref<1x128xf32, #tpu.memory_space<vmem>>, %arg4: memref<128x128xbf16, #tpu.memory_space<vmem>>, %arg5: memref<1x128xf32, #tpu.memory_space<vmem>>, %arg6: memref<128x128xbf16, #tpu.memory_space<vmem>>, %arg7: memref<1x128xf32, #tpu.memory_space<vmem>>, %arg8: memref<128x128xbf16, #tpu.memory_space<vmem>>, %arg9: memref<1x128xf32, #tpu.memory_space<vmem>>, %arg10: memref<1x128xf32, #tpu.memory_space<vmem>>) attributes {dimension_semantics = [#tpu.dimension_semantics<parallel>], iteration_bounds = array<i64: 2>, scalar_prefetch = 0 : i64, scratch_operands = 0 : i64, tpu.core_type = #tpu.core_type<tc>, window_params = [{transform_indices = @transform_0, window_bounds = array<i64: 128, 68>}, {pipeline_mode = #tpu.pipeline_mode<synchronous>, transform_indices = @transform_1, window_bounds = array<i64: 68, 128>}, {pipeline_mode = #tpu.pipeline_mode<synchronous>, transform_indices = @transform_2, window_bounds = array<i64: 1, 128>}, {pipeline_mode = #tpu.pipeline_mode<synchronous>, transform_indices = @transform_3, window_bounds = array<i64: 128, 128>}, {pipeline_mode = #tpu.pipeline_mode<synchronous>, transform_indices = @transform_4, window_bounds = array<i64: 1, 128>}, {pipeline_mode = #tpu.pipeline_mode<synchronous>, transform_indices = @transform_5, window_bounds = array<i64: 128, 128>}, {pipeline_mode = #tpu.pipeline_mode<synchronous>, transform_indices = @transform_6, window_bounds = array<i64: 1, 128>}, {pipeline_mode = #tpu.pipeline_mode<synchronous>, transform_indices = @transform_7, window_bounds = array<i64: 128, 128>}, {pipeline_mode = #tpu.pipeline_mode<synchronous>, transform_indices = @transform_8, window_bounds = array<i64: 1, 128>}, {transform_indices = @transform_9, window_bounds = array<i64: 1, 128>}]} {
    %c0 = arith.constant 0 : index
    %c0_0 = arith.constant 0 : index
    %0 = vector.load %arg1[%c0, %c0_0] : memref<128x68xf32, #tpu.memory_space<vmem>>, vector<128x68xf32>
    %1 = arith.truncf %0 : vector<128x68xf32> to vector<128x68xbf16>
    %c0_1 = arith.constant 0 : index
    %c0_2 = arith.constant 0 : index
    %2 = vector.load %arg2[%c0_1, %c0_2] : memref<68x128xbf16, #tpu.memory_space<vmem>>, vector<68x128xbf16>
    %cst = arith.constant dense<0.000000e+00> : vector<128x128xf32>
    %3 = tpu.matmul %1, %2, %cst {dimension_numbers = #tpu.dot_dimension_numbers<[1], [0], [0], [1], [0, 0, 1, 1], [], []>} : vector<128x68xbf16>, vector<68x128xbf16>, vector<128x128xf32> -> vector<128x128xf32>
    %c0_3 = arith.constant 0 : index
    %c0_4 = arith.constant 0 : index
    %4 = vector.load %arg3[%c0_3, %c0_4] : memref<1x128xf32, #tpu.memory_space<vmem>>, vector<1x128xf32>
    %5 = vector.broadcast %4 : vector<1x128xf32> to vector<128x128xf32>
    %6 = arith.addf %3, %5 : vector<128x128xf32>
    %cst_5 = arith.constant 0.000000e+00 : f32
    %7 = vector.broadcast %cst_5 : f32 to vector<128x128xf32>
    %8 = arith.maximumf %6, %7 : vector<128x128xf32>
    %9 = arith.truncf %8 : vector<128x128xf32> to vector<128x128xbf16>
    %c0_6 = arith.constant 0 : index
    %c0_7 = arith.constant 0 : index
    %10 = vector.load %arg4[%c0_6, %c0_7] : memref<128x128xbf16, #tpu.memory_space<vmem>>, vector<128x128xbf16>
    %cst_8 = arith.constant dense<0.000000e+00> : vector<128x128xf32>
    %11 = tpu.matmul %9, %10, %cst_8 {dimension_numbers = #tpu.dot_dimension_numbers<[1], [0], [0], [1], [0, 0, 1, 1], [], []>} : vector<128x128xbf16>, vector<128x128xbf16>, vector<128x128xf32> -> vector<128x128xf32>
    %c0_9 = arith.constant 0 : index
    %c0_10 = arith.constant 0 : index
    %12 = vector.load %arg5[%c0_9, %c0_10] : memref<1x128xf32, #tpu.memory_space<vmem>>, vector<1x128xf32>
    %13 = vector.broadcast %12 : vector<1x128xf32> to vector<128x128xf32>
    %14 = arith.addf %11, %13 : vector<128x128xf32>
    %cst_11 = arith.constant 0.000000e+00 : f32
    %15 = vector.broadcast %cst_11 : f32 to vector<128x128xf32>
    %16 = arith.maximumf %14, %15 : vector<128x128xf32>
    %17 = arith.truncf %16 : vector<128x128xf32> to vector<128x128xbf16>
    %c0_12 = arith.constant 0 : index
    %c0_13 = arith.constant 0 : index
    %18 = vector.load %arg6[%c0_12, %c0_13] : memref<128x128xbf16, #tpu.memory_space<vmem>>, vector<128x128xbf16>
    %cst_14 = arith.constant dense<0.000000e+00> : vector<128x128xf32>
    %19 = tpu.matmul %17, %18, %cst_14 {dimension_numbers = #tpu.dot_dimension_numbers<[1], [0], [0], [1], [0, 0, 1, 1], [], []>} : vector<128x128xbf16>, vector<128x128xbf16>, vector<128x128xf32> -> vector<128x128xf32>
    %c0_15 = arith.constant 0 : index
    %c0_16 = arith.constant 0 : index
    %20 = vector.load %arg7[%c0_15, %c0_16] : memref<1x128xf32, #tpu.memory_space<vmem>>, vector<1x128xf32>
    %21 = vector.broadcast %20 : vector<1x128xf32> to vector<128x128xf32>
    %22 = arith.addf %19, %21 : vector<128x128xf32>
    %cst_17 = arith.constant 0.000000e+00 : f32
    %23 = vector.broadcast %cst_17 : f32 to vector<128x128xf32>
    %24 = arith.maximumf %22, %23 : vector<128x128xf32>
    %25 = arith.truncf %24 : vector<128x128xf32> to vector<128x128xbf16>
    %c0_18 = arith.constant 0 : index
    %c0_19 = arith.constant 0 : index
    %26 = vector.load %arg8[%c0_18, %c0_19] : memref<128x128xbf16, #tpu.memory_space<vmem>>, vector<128x128xbf16>
    %cst_20 = arith.constant dense<0.000000e+00> : vector<128x128xf32>
    %27 = tpu.matmul %25, %26, %cst_20 {dimension_numbers = #tpu.dot_dimension_numbers<[1], [0], [0], [1], [0, 0, 1, 1], [], []>} : vector<128x128xbf16>, vector<128x128xbf16>, vector<128x128xf32> -> vector<128x128xf32>
    %c0_21 = arith.constant 0 : index
    %c0_22 = arith.constant 0 : index
    %28 = vector.load %arg9[%c0_21, %c0_22] : memref<1x128xf32, #tpu.memory_space<vmem>>, vector<1x128xf32>
    %29 = vector.broadcast %28 : vector<1x128xf32> to vector<128x128xf32>
    %30 = arith.addf %27, %29 : vector<128x128xf32>
    %31 = tpu.transpose %30, [1, 0] : vector<128x128xf32> -> vector<128x128xf32>
    %32 = vector.extract_strided_slice %31 {offsets = [0, 0], sizes = [1, 128], strides = [1, 1]} : vector<128x128xf32> to vector<1x128xf32>
    %33 = arith.negf %32 : vector<1x128xf32>
    %34 = math.exp %33 : vector<1x128xf32>
    %cst_23 = arith.constant 1.000000e+00 : f32
    %35 = vector.broadcast %cst_23 : f32 to vector<1x128xf32>
    %36 = arith.addf %35, %34 : vector<1x128xf32>
    %37 = arith.divf %35, %36 : vector<1x128xf32>
    %c0_24 = arith.constant 0 : index
    %c0_25 = arith.constant 0 : index
    %38 = vector.load %arg10[%c0_24, %c0_25] : memref<1x128xf32, #tpu.memory_space<vmem>>, vector<1x128xf32>
    tpu.vector_store %arg10[%c0_24, %c0_25], %37 {strides = array<i32>} : memref<1x128xf32, #tpu.memory_space<vmem>>, vector<1x128xf32>,
    return
  }
  func.func @transform_0(%arg0: i32) -> (i32, i32) {
    %c0_i32 = arith.constant 0 : i32
    %c0_i32_0 = arith.constant 0 : i32
    return %arg0, %c0_i32 : i32, i32
  }
  func.func @transform_1(%arg0: i32) -> (i32, i32) {
    %c0_i32 = arith.constant 0 : i32
    %c0_i32_0 = arith.constant 0 : i32
    %c0_i32_1 = arith.constant 0 : i32
    return %c0_i32, %c0_i32_0 : i32, i32
  }
  func.func @transform_2(%arg0: i32) -> (i32, i32) {
    %c0_i32 = arith.constant 0 : i32
    %c0_i32_0 = arith.constant 0 : i32
    %c0_i32_1 = arith.constant 0 : i32
    return %c0_i32, %c0_i32_0 : i32, i32
  }
  func.func @transform_3(%arg0: i32) -> (i32, i32) {
    %c0_i32 = arith.constant 0 : i32
    %c0_i32_0 = arith.constant 0 : i32
    %c0_i32_1 = arith.constant 0 : i32
    return %c0_i32, %c0_i32_0 : i32, i32
  }
  func.func @transform_4(%arg0: i32) -> (i32, i32) {
    %c0_i32 = arith.constant 0 : i32
    %c0_i32_0 = arith.constant 0 : i32
    %c0_i32_1 = arith.constant 0 : i32
    return %c0_i32, %c0_i32_0 : i32, i32
  }
  func.func @transform_5(%arg0: i32) -> (i32, i32) {
    %c0_i32 = arith.constant 0 : i32
    %c0_i32_0 = arith.constant 0 : i32
    %c0_i32_1 = arith.constant 0 : i32
    return %c0_i32, %c0_i32_0 : i32, i32
  }
  func.func @transform_6(%arg0: i32) -> (i32, i32) {
    %c0_i32 = arith.constant 0 : i32
    %c0_i32_0 = arith.constant 0 : i32
    %c0_i32_1 = arith.constant 0 : i32
    return %c0_i32, %c0_i32_0 : i32, i32
  }
  func.func @transform_7(%arg0: i32) -> (i32, i32) {
    %c0_i32 = arith.constant 0 : i32
    %c0_i32_0 = arith.constant 0 : i32
    %c0_i32_1 = arith.constant 0 : i32
    return %c0_i32, %c0_i32_0 : i32, i32
  }
  func.func @transform_8(%arg0: i32) -> (i32, i32) {
    %c0_i32 = arith.constant 0 : i32
    %c0_i32_0 = arith.constant 0 : i32
    %c0_i32_1 = arith.constant 0 : i32
    return %c0_i32, %c0_i32_0 : i32, i32
  }
  func.func @transform_9(%arg0: i32) -> (i32, i32) {
    %c0_i32 = arith.constant 0 : i32
    %c0_i32_0 = arith.constant 0 : i32
    return %c0_i32, %arg0 : i32, i32
  }
}

</mosaic_0001>

<bundles_post_ra>
// kernel: tpu_custom_call.1
= control target key start
LH: loop header
LB: loop body
LE: loop exit
PB: predicated region body
PF: predicated region fallthrough
CT: control target
= control target key end

     0   :  { %14 = vsyncpa [#allocation3], 0  ;;  %s1846_s0 = inlined_call_operand.vmem [shape: f32[256,68], index: 0, kind: input, shape index: {}]   ;;  %s1847_s1 = inlined_call_operand.vmem [shape: bf16[68,128], index: 1, kind: input, shape index: {}]   ;;  %s1848_s2 = inlined_call_operand.vmem [shape: f32[1,128], index: 2, kind: input, shape index: {}]   ;;  %s1849_s3 = inlined_call_operand.vmem [shape: bf16[128,128], index: 3, kind: input, shape index: {}]   ;;  %s1850_s4 = inlined_call_operand.vmem [shape: f32[1,128], index: 4, kind: input, shape index: {}]   ;;  %s1851_s5 = inlined_call_operand.vmem [shape: bf16[128,128], index: 5, kind: input, shape index: {}]   ;;  %s1852_s6 = inlined_call_operand.vmem [shape: f32[1,128], index: 6, kind: input, shape index: {}]   ;;  %s1853_s7 = inlined_call_operand.vmem [shape: bf16[128,128], index: 7, kind: input, shape index: {}]   ;;  %s1854_s8 = inlined_call_operand.vmem [shape: f32[1,128], index: 8, kind: input, shape index: {}]   ;;  %s1855_s9 = inlined_call_operand.hbm [shape: f32[1,256], index: 9, kind: output, shape index: {}]  }
   0x1   :  { %16 = vsyncpa [#allocation3 + $0x1], 0  ;;  %s1629_s30 = smov 0   ;;  %s1631_s10 = smov 0  }
   0x2   :  { %s1633_s11 = smov 0   ;;  %s1635_s12 = smov 0  }
   0x3 LB: > { %s1208_s13 = sadd.s32 4294967295, %s1576_s12   ;;  %s1209_s14 = sadd.s32 4294967294, %s1576_s12   ;;  %s1576_s12 = sphi %s1635_s12, %s1861_s12   ;;  %s1572_s11 = sphi %s1633_s11, %s1860_s11   ;;  %s1568_s10 = sphi %s1631_s10, %s1859_s10   ;;  %s1564_s30 = sphi %s1629_s30, %s1858_s30  }
   0x4   : > { %s1652_s15 = sadd.s32 1, %s1576_s12   ;;  %s223_s16 = sadd.s32 1, %s1572_s11 }
   0x5   : > { %s220_s17 = ssub.s32 %s1576_s12, %s1652_s15  ;;  %p233_p0 = scmp.ne.s32.totalorder %s1572_s11, %s1568_s10 }
   0x6   : > { %p221_p1 = scmp.eq.s32.totalorder %s220_s17, 0  ;;  %p234_p2 = scmp.eq.s32.totalorder %s1208_s13, 1 }
   0x7   : > { %p239_p3 = scmp.ne.s32.totalorder %s1568_s10, %s1564_s30  ;;  %p240_p4 = scmp.eq.s32.totalorder %s1209_s14, 1 }
   0x8   : > { %s1662_s18 = scalar_select %p221_p1, %s1572_s11, %s223_s16  }
   0x9   : > { %p1664_p5 = por %p234_p2, %p233_p0  ;;  %p1668_p6 = por %p240_p4, %p239_p3 }
   0xa   : > { %p1212_p7 = scmp.ge.s32.totalorder %s1576_s12, 1  ;;  %p291_p8 = scmp.lt.s32.totalorder %s1576_s12, 3 }
   0xc   : > { %p292_p9 = pnand %p1212_p7, %p291_p8 }
   0xd   : > { %s1680_s25 = sshll.u32 (!%p292_p9), %s1208_s13, 4 }
   0xe   : > { %295 = sbr.rel (%p292_p9) target bundleno = 1025 (0x401), region = 56  ;;  %p327_p10 = scmp.lt.s32.totalorder (!%p292_p9), %s1680_s25, 31 }
   0xf   : > { %s1811_s27 = scalar_lea.hbm (!%p292_p9), %s1855_s9, %s1680_s25 }
  0x13   : > { %v1483_v0 = vld [vmem:[%s1847_s1 + $0x20] ss:$0 sps:$4 sm:$0x33]   ;;  %vm425_vm0 = vcmask 1041408   ;;  %v1484_v1 = vld [vmem:[%s1847_s1 + $0x18] sm:$0xff]   ;;  %v1485_v3 = vld [vmem:[%s1847_s1 + $0x10] sm:$0xff]  }
  0x14   : > { %1443 = vmatprep.subr.msk.bf16.mxu0 %vm425_vm0, %v1483_v0  ;;  %v427_v2 = vsel %vm425_vm0, %v1483_v0, 0  ;;  %s328_s28 = scalar_select %p327_p10, %s1680_s25, 31  ;;  %v1488_v4 = vld [vmem:[%s1849_s3 + $0x38] sm:$0xff]   ;;  %v1489_v5 = vld [vmem:[%s1849_s3 + $0x30] sm:$0xff]   ;;  %v1486_v6 = vld [vmem:[%s1847_s1 + $0x8] sm:$0xff]   ;;  %vm400_vm1 = vcmask 556032  }
  0x15   : > { %1322 = vmatpush3.bf16.msra.mxu0 %v427_v2  ;;  %1347 = vmatprep.subr.bf16.mxu1 %v1488_v4  ;;  %v1490_v10 = vld [vmem:[%s1849_s3 + $0x28] sm:$0xff]   ;;  %v1487_v11 = vld [vmem:[%s1847_s1] sm:$0xff]   ;;  %v1492_v17 = vld [vmem:[%s1849_s3 + $0x18] sm:$0xff]  }
  0x16   : > { %1323 = vmatprep.subr.bf16.mxu0 %v1484_v1  ;;  %s1214_s13 = sshll.u32 %s328_s28, 3  ;;  %1348 = vmatpush3.bf16.msra.mxu1 %v1488_v4  ;;  %v1491_v14 = vld [vmem:[%s1849_s3 + $0x20] sm:$0xff]   ;;  %v1493_v35 = vld [vmem:[%s1849_s3 + $0x10] sm:$0xff]   ;;  %v1494_v36 = vld [vmem:[%s1849_s3 + $0x8] sm:$0xff]  }
  0x17   : > { %s1699_s26 = scalar_lea.vmem %s1846_s0, %s1214_s13  ;;  %1349 = vmatprep.subr.bf16.mxu1 %v1489_v5  ;;  %v1495_v37 = vld [vmem:[%s1849_s3] sm:$0xff]   ;;  %v1496_v38 = vld [vmem:[%s1851_s5 + $0x38] sm:$0xff]   ;;  %v1497_v39 = vld [vmem:[%s1851_s5 + $0x30] sm:$0xff]   ;;  %s324_s13 = sand.u32 1, %s1568_s10  }
  0x18   : > { %v333_v7 = vld [vmem:[%s1699_s26] sm:$0xff]  ;;  %v334_v8 = vld [vmem:[%s1699_s26 + $0x8] sm:$0xff]  ;;  %v335_v12 = vld [vmem:[%s1699_s26 + $0x10] sm:$0xff]  ;;  %s325_s21 = scalar_lea.vmem [#allocation2], %s324_s13  ;;  %s1142_s28 = scalar_lea.sflag [#allocation3], %s324_s13 }
  0x19   : > { %1324 = vmatpush3.bf16.msra.mxu0 %v1484_v1  ;;  %v349_v9 = vpack.c.bf16 %v334_v8, %v333_v7  ;;  %v336_v13 = vld [vmem:[%s1699_s26 + $0x18] sm:$0xff]  ;;  %v337_v15 = vld [vmem:[%s1699_s26 + $0x20] sm:$0xff]  ;;  %v338_v16 = vld [vmem:[%s1699_s26 + $0x28] sm:$0xff]  ;;  %s1154_s22 = sshll.u32 %s325_s21, 4  ;;  %s1155_s22 = int_to_ptr.vmem [resolvable:$true] %s1154_s22 }
  0x1a   : > { %1325 = vmatprep.subr.bf16.mxu0 %v1485_v3  ;;  %1350 = vmatpush3.bf16.msra.mxu1 %v1489_v5  ;;  %v350_v18 = vpack.c.bf16 %v336_v13, %v335_v12  ;;  %v351_v19 = vpack.c.bf16 %v338_v16, %v337_v15  ;;  %v339_v20 = vld [vmem:[%s1699_s26 + $0x30] sm:$0xff]  ;;  %v340_v21 = vld [vmem:[%s1699_s26 + $0x38] sm:$0xff]  ;;  %v341_v22 = vld [vmem:[%s1699_s26 + $0x40] sm:$0xff]  ;;  %s1516_s29 = scalar_lea.vmem %s1155_s22, 16 }
  0x1b   : > { %1331 = vmatprep.mubr.msk.bf16.mxu0 %vm400_vm1, %v349_v9  ;;  %1351 = vmatprep.subr.bf16.mxu1 %v1490_v10  ;;  %v342_v23 = vld [vmem:[%s1699_s26 + $0x48] sm:$0xff]  ;;  %v352_v24 = vpack.c.bf16 %v340_v21, %v339_v20  ;;  %v343_v26 = vld [vmem:[%s1699_s26 + $0x50] sm:$0xff]  ;;  %v344_v27 = vld [vmem:[%s1699_s26 + $0x58] sm:$0xff]  ;;  %p1517_p11 = scmp.ne.s32.totalorder %s1155_s22, %s1516_s29 }
  0x1c   : > { %v353_v25 = vpack.c.bf16 %v342_v23, %v341_v22  ;;  %v345_v28 = vld [vmem:[%s1699_s26 + $0x60] sm:$0xff]  ;;  %v346_v29 = vld [vmem:[%s1699_s26 + $0x68] sm:$0xff]  ;;  %v354_v30 = vpack.c.bf16 %v344_v27, %v343_v26  ;;  %v347_v32 = vld [vmem:[%s1699_s26 + $0x70] sm:$0xff] }
  0x1d   : > { %1326 = vmatpush3.bf16.msra.mxu0 %v1485_v3  ;;  %v355_v31 = vpack.c.bf16 %v346_v29, %v345_v28  ;;  %v348_v33 = vld [vmem:[%s1699_s26 + $0x78] sm:$0xff]  ;;  %v1498_v40 = vld [vmem:[%s1851_s5 + $0x28] sm:$0xff]   ;;  %v1499_v41 = vld [vmem:[%s1851_s5 + $0x20] sm:$0xff]   ;;  %p1518_p12 = pnand %p1517_p11, %p1664_p5  ;;  %s1578_s26 = smov [#allocation2]  }
  0x1e   : > { %1327 = vmatprep.subr.bf16.mxu0 %v1486_v6  ;;  %1352 = vmatpush3.bf16.msra.mxu1 %v1490_v10  ;;  %v356_v34 = vpack.c.bf16 %v348_v33, %v347_v32  ;;  %v1500_v42 = vld [vmem:[%s1851_s5 + $0x18] sm:$0xff]   ;;  %v1215_v45 = vld [vmem:[%s1848_s2] ss:$0 sm:$0xff]  ;;  %s1520_s14 = sshll.u32 %s1578_s26, 4  ;;  %s1521_s14 = int_to_ptr.vmem [resolvable:$false] %s1520_s14 }
  0x1f   : > { %1353 = vmatprep.subr.bf16.mxu1 %v1491_v14  ;;  %p1519_p13 = pneg %p1518_p12  ;;  %s1522_s16 = scalar_lea.vmem %s1521_s14, 32 }
  0x20   : > { %p1523_p0 = scmp.lt.s32.totalorder %s1155_s22, %s1521_s14  ;;  %p1524_p1 = scmp.lt.s32.totalorder %s1522_s16, %s1516_s29 }
  0x21   : > { %1328 = vmatpush3.bf16.msra.mxu0 %v1486_v6 }
  0x22   : > { %1329 = vmatprep.subr.bf16.mxu0 %v1487_v11  ;;  %1354 = vmatpush3.bf16.msra.mxu1 %v1491_v14  ;;  %p1525_p2 = por %p1524_p1, %p1523_p0 }
  0x23   : > { %1355 = vmatprep.subr.bf16.mxu1 %v1492_v17 }
  0x24   : > { %p1526_p3 = pnand %p1525_p2, %p1519_p13 }
  0x25   : > { %1330 = vmatpush3.bf16.msra.mxu0 %v1487_v11 }
  0x26   : > { %1356 = vmatpush3.bf16.msra.mxu1 %v1492_v17  ;;  %1379 = vmatprep.subr.bf16.mxu0 %v1496_v38 }
  0x27   : > { %1357 = vmatprep.subr.bf16.mxu1 %v1493_v35 }
  0x28   : > { %1332 = vmatmul.mubr.msk.bf16.vlgmr.msra.gmra.mxu0 %vm400_vm1, %v350_v18 }
  0x29   : > { %1335 = vmatprep.mubr.msk.bf16.mxu0 %vm400_vm1, %v351_v19  ;;  %1380 = vmatpush3.bf16.msra.mxu0 %v1496_v38  ;;  %v1503_v38 = vld [vmem:[%s1851_s5] sm:$0xff]  }
  0x2a   : > { %1358 = vmatpush3.bf16.msra.mxu1 %v1493_v35  ;;  %1381 = vmatprep.subr.bf16.mxu0 %v1497_v39 }
  0x2b   : > { %1359 = vmatprep.subr.bf16.mxu1 %v1494_v36 }
  0x2d   : > { %1382 = vmatpush3.bf16.msra.mxu0 %v1497_v39  ;;  %v1504_v39 = vld [vmem:[%s1853_s7 + $0x38] sm:$0xff]  }
  0x2e   : > { %1360 = vmatpush3.bf16.msra.mxu1 %v1494_v36  ;;  %1383 = vmatprep.subr.bf16.mxu0 %v1498_v40  ;;  %v1501_v36 = vld [vmem:[%s1851_s5 + $0x10] sm:$0xff]  }
  0x2f   : > { %1361 = vmatprep.subr.bf16.mxu1 %v1495_v37 }
  0x30   : > { %1336 = vmatmul.mubr.msk.bf16.gmra.mxu0 %vm400_vm1, %v352_v24 }
  0x31   : > { %1339 = vmatprep.mubr.msk.bf16.mxu0 %vm400_vm1, %v353_v25  ;;  %1384 = vmatpush3.bf16.msra.mxu0 %v1498_v40  ;;  %v1505_v40 = vld [vmem:[%s1853_s7 + $0x30] sm:$0xff]  }
  0x32   : > { %1362 = vmatpush3.bf16.msra.mxu1 %v1495_v37  ;;  %1385 = vmatprep.subr.bf16.mxu0 %v1499_v41  ;;  %v1502_v37 = vld [vmem:[%s1851_s5 + $0x8] sm:$0xff]  }
  0x33   : > { %1411 = vmatprep.subr.bf16.mxu1 %v1504_v39 }
  0x35   : > { %1386 = vmatpush3.bf16.msra.mxu0 %v1499_v41  ;;  %v1506_v41 = vld [vmem:[%s1853_s7 + $0x28] sm:$0xff]  }
  0x36   : > { %1387 = vmatprep.subr.bf16.mxu0 %v1500_v42 }
  0x38   : > { %1340 = vmatmul.mubr.msk.bf16.gmra.mxu0 %vm400_vm1, %v354_v30 }
  0x39   : > { %1343 = vmatprep.mubr.msk.bf16.mxu0 %vm400_vm1, %v355_v31  ;;  %1388 = vmatpush3.bf16.msra.mxu0 %v1500_v42  ;;  %v1507_v42 = vld [vmem:[%s1853_s7 + $0x20] sm:$0xff]  }
  0x3a   : > { %1389 = vmatprep.subr.bf16.mxu0 %v1501_v36 }
  0x3d   : > { %1390 = vmatpush3.bf16.msra.mxu0 %v1501_v36 }
  0x3e   : > { %1391 = vmatprep.subr.bf16.mxu0 %v1502_v37 }
  0x40   : > { %1344 = vmatmul.mubr.msk.bf16.gmra.mxu0 %vm400_vm1, %v356_v34 }
  0x41   : > { %1392 = vmatpush3.bf16.msra.mxu0 %v1502_v37  ;;  %v1509_v37 = vld [vmem:[%s1853_s7 + $0x10] sm:$0xff]  }
  0x42   : > { %1393 = vmatprep.subr.bf16.mxu0 %v1503_v38 }
  0x45   : > { %1394 = vmatpush3.bf16.msra.mxu0 %v1503_v38  ;;  %v1510_v38 = vld [vmem:[%s1853_s7 + $0x8] sm:$0xff]  }
  0xe8   : > { %v1333_v43 = vpop.f32.mrf.mxu0 }
  0xe9   : > { %v472_v49 = vadd.f32 %v1333_v43, %v1215_v45  ;;  %v1508_v43 = vld [vmem:[%s1853_s7 + $0x18] sm:$0xff]  }
  0xea   : > { %v463_v44 = vpop.f32.mrf.mxu0 }
  0xeb   : > { %v464_v47 = vadd.f32 %v1215_v45, %v463_v44  ;;  %v528_v56 = vmax.f32 %v472_v49, 0.0 }
  0xec   : > { %v1334_v46 = vpop.f32.mrf.mxu0 }
  0xed   : > { %v475_v48 = vadd.f32 %v1334_v46, %v1215_v45  ;;  %v526_v54 = vmax.f32 %v464_v47, 0.0  ;;  %v1229_v46 = vld [vmem:[%s1850_s4] ss:$0 sm:$0xff] }
  0xee   : > { %v466_v50 = vpop.f32.mrf.mxu0 }
  0xef   : > { %v467_v51 = vadd.f32 %v1215_v45, %v466_v50  ;;  %v529_v52 = vmax.f32 %v475_v48, 0.0 }
  0xf0   : > { %v1337_v53 = vpop.f32.mrf.mxu0 }
  0xf1   : > { %v527_v55 = vmax.f32 %v467_v51, 0.0  ;;  %v488_v57 = vadd.f32 %v1337_v53, %v1215_v45  ;;  %v543_v61 = vpack.c.bf16 %v529_v52, %v528_v56 }
  0xf2   : > { %v479_v58 = vpop.f32.mrf.mxu0 }
  0xf3   : > { %v480_v59 = vadd.f32 %v1215_v45, %v479_v58  ;;  %v542_v60 = vpack.c.bf16 %v527_v55, %v526_v54  ;;  %v532_v0 = vmax.f32 %v488_v57, 0.0 }
  0xf4   : > { %v1338_v62 = vpop.f32.mrf.mxu0 }
  0xf5   : > { %v491_v63 = vadd.f32 %v1338_v62, %v1215_v45  ;;  %1363 = vmatprep.mubr.bf16.mxu1 %v542_v60  ;;  %v530_v2 = vmax.f32 %v480_v59, 0.0 }
  0xf6   : > { %v482_v1 = vpop.f32.mrf.mxu0  ;;  %1364 = vmatmul.mubr.bf16.vlgmr.msra.gmra.mxu1 %v543_v61 }
  0xf7   : > { %v533_v3 = vmax.f32 %v491_v63, 0.0  ;;  %v483_v4 = vadd.f32 %v1215_v45, %v482_v1  ;;  %1412 = vmatpush3.bf16.msra.mxu1 %v1504_v39  ;;  %v1511_v39 = vld [vmem:[%s1853_s7] sm:$0xff]  }
  0xf8   : > { %v1341_v5 = vpop.f32.mrf.mxu0  ;;  %1413 = vmatprep.subr.bf16.mxu1 %v1505_v40 }
  0xf9   : > { %v531_v6 = vmax.f32 %v483_v4, 0.0  ;;  %v545_v7 = vpack.c.bf16 %v533_v3, %v532_v0  ;;  %v504_v8 = vadd.f32 %v1341_v5, %v1215_v45 }
  0xfa   : > { %v495_v9 = vpop.f32.mrf.mxu0 }
  0xfb   : > { %v544_v10 = vpack.c.bf16 %v531_v6, %v530_v2  ;;  %v496_v11 = vadd.f32 %v1215_v45, %v495_v9  ;;  %v536_v14 = vmax.f32 %v504_v8, 0.0  ;;  %1414 = vmatpush3.bf16.msra.mxu1 %v1505_v40 }
  0xfc   : > { %v1342_v12 = vpop.f32.mrf.mxu0  ;;  %1415 = vmatprep.subr.bf16.mxu1 %v1506_v41 }
  0xfd   : > { %v507_v13 = vadd.f32 %v1342_v12, %v1215_v45  ;;  %1367 = vmatprep.mubr.bf16.mxu1 %v544_v10  ;;  %v534_v16 = vmax.f32 %v496_v11, 0.0 }
  0xfe   : > { %v498_v15 = vpop.f32.mrf.mxu0  ;;  %1368 = vmatmul.mubr.bf16.gmra.mxu1 %v545_v7 }
  0xff   : > { %v537_v17 = vmax.f32 %v507_v13, 0.0  ;;  %v499_v18 = vadd.f32 %v1215_v45, %v498_v15  ;;  %1416 = vmatpush3.bf16.msra.mxu1 %v1506_v41 }
 0x100   : > { %v1345_v19 = vpop.f32.mrf.mxu0  ;;  %1417 = vmatprep.subr.bf16.mxu1 %v1507_v42 }
 0x101   : > { %v535_v20 = vmax.f32 %v499_v18, 0.0  ;;  %v547_v21 = vpack.c.bf16 %v537_v17, %v536_v14  ;;  %v520_v22 = vadd.f32 %v1345_v19, %v1215_v45 }
 0x102   : > { %v511_v23 = vpop.f32.mrf.mxu0 }
 0x103   : > { %v546_v24 = vpack.c.bf16 %v535_v20, %v534_v16  ;;  %v512_v25 = vadd.f32 %v1215_v45, %v511_v23  ;;  %v540_v28 = vmax.f32 %v520_v22, 0.0  ;;  %1418 = vmatpush3.bf16.msra.mxu1 %v1507_v42  ;;  %v1238_v42 = vld [vmem:[%s1852_s6] ss:$0 sm:$0xff] }
 0x104   : > { %v1346_v26 = vpop.f32.mrf.mxu0  ;;  %1419 = vmatprep.subr.bf16.mxu1 %v1508_v43 }
 0x105   : > { %v523_v27 = vadd.f32 %v1346_v26, %v1215_v45  ;;  %1371 = vmatprep.mubr.bf16.mxu1 %v546_v24  ;;  %v538_v30 = vmax.f32 %v512_v25, 0.0 }
 0x106   : > { %v514_v29 = vpop.f32.mrf.mxu0  ;;  %1372 = vmatmul.mubr.bf16.gmra.mxu1 %v547_v21 }
 0x107   : > { %v541_v31 = vmax.f32 %v523_v27, 0.0  ;;  %v515_v32 = vadd.f32 %v1215_v45, %v514_v29  ;;  %1420 = vmatpush3.bf16.msra.mxu1 %v1508_v43 }
 0x108   : > { %1421 = vmatprep.subr.bf16.mxu1 %v1509_v37 }
 0x109   : > { %v539_v33 = vmax.f32 %v515_v32, 0.0  ;;  %v549_v34 = vpack.c.bf16 %v541_v31, %v540_v28 }
 0x10b   : > { %v548_v35 = vpack.c.bf16 %v539_v33, %v538_v30  ;;  %1422 = vmatpush3.bf16.msra.mxu1 %v1509_v37 }
 0x10c   : > { %1423 = vmatprep.subr.bf16.mxu1 %v1510_v38 }
 0x10d   : > { %1375 = vmatprep.mubr.bf16.mxu1 %v548_v35 }
 0x10e   : > { %1376 = vmatmul.mubr.bf16.gmra.mxu1 %v549_v34 }
 0x10f   : > { %1424 = vmatpush3.bf16.msra.mxu1 %v1510_v38 }
 0x110   : > { %1425 = vmatprep.subr.bf16.mxu1 %v1511_v39 }
 0x113   : > { %1426 = vmatpush3.bf16.msra.mxu1 %v1511_v39 }
 0x1b6   : > { %v1365_v44 = vpop.f32.mrf.mxu1 }
 0x1b7   : > { %v664_v50 = vadd.f32 %v1365_v44, %v1229_v46 }
 0x1b8   : > { %v655_v45 = vpop.f32.mrf.mxu1 }
 0x1b9   : > { %v656_v48 = vadd.f32 %v1229_v46, %v655_v45  ;;  %v720_v57 = vmax.f32 %v664_v50, 0.0 }
 0x1ba   : > { %v1366_v47 = vpop.f32.mrf.mxu1 }
 0x1bb   : > { %v667_v49 = vadd.f32 %v1366_v47, %v1229_v46  ;;  %v718_v55 = vmax.f32 %v656_v48, 0.0 }
 0x1bc   : > { %v658_v51 = vpop.f32.mrf.mxu1 }
 0x1bd   : > { %v659_v52 = vadd.f32 %v1229_v46, %v658_v51  ;;  %v721_v53 = vmax.f32 %v667_v49, 0.0 }
 0x1be   : > { %v1369_v54 = vpop.f32.mrf.mxu1 }
 0x1bf   : > { %v719_v56 = vmax.f32 %v659_v52, 0.0  ;;  %v735_v60 = vpack.c.bf16 %v721_v53, %v720_v57  ;;  %v680_v0 = vadd.f32 %v1369_v54, %v1229_v46 }
 0x1c0   : > { %v671_v58 = vpop.f32.mrf.mxu1 }
 0x1c1   : > { %v734_v59 = vpack.c.bf16 %v719_v56, %v718_v55  ;;  %v672_v62 = vadd.f32 %v1229_v46, %v671_v58  ;;  %v724_v7 = vmax.f32 %v680_v0, 0.0 }
 0x1c2   : > { %v1370_v61 = vpop.f32.mrf.mxu1 }
 0x1c3   : > { %v683_v63 = vadd.f32 %v1370_v61, %v1229_v46  ;;  %1395 = vmatprep.mubr.bf16.mxu0 %v734_v59  ;;  %v722_v5 = vmax.f32 %v672_v62, 0.0 }
 0x1c4   : > { %v674_v1 = vpop.f32.mrf.mxu1  ;;  %1396 = vmatmul.mubr.bf16.vlgmr.msra.gmra.mxu0 %v735_v60 }
 0x1c5   : > { %v675_v2 = vadd.f32 %v1229_v46, %v674_v1  ;;  %v725_v3 = vmax.f32 %v683_v63, 0.0 }
 0x1c6   : > { %v1373_v4 = vpop.f32.mrf.mxu1 }
 0x1c7   : > { %v723_v6 = vmax.f32 %v675_v2, 0.0  ;;  %v696_v8 = vadd.f32 %v1373_v4, %v1229_v46  ;;  %v737_v12 = vpack.c.bf16 %v725_v3, %v724_v7 }
 0x1c8   : > { %v687_v9 = vpop.f32.mrf.mxu1 }
 0x1c9   : > { %v736_v10 = vpack.c.bf16 %v723_v6, %v722_v5  ;;  %v688_v11 = vadd.f32 %v1229_v46, %v687_v9  ;;  %v728_v15 = vmax.f32 %v696_v8, 0.0 }
 0x1ca   : > { %v1374_v13 = vpop.f32.mrf.mxu1 }
 0x1cb   : > { %v699_v14 = vadd.f32 %v1374_v13, %v1229_v46  ;;  %1399 = vmatprep.mubr.bf16.mxu0 %v736_v10  ;;  %v726_v17 = vmax.f32 %v688_v11, 0.0 }
 0x1cc   : > { %v690_v16 = vpop.f32.mrf.mxu1  ;;  %1400 = vmatmul.mubr.bf16.gmra.mxu0 %v737_v12 }
 0x1cd   : > { %v729_v18 = vmax.f32 %v699_v14, 0.0  ;;  %v691_v19 = vadd.f32 %v1229_v46, %v690_v16 }
 0x1ce   : > { %v1377_v20 = vpop.f32.mrf.mxu1 }
 0x1cf   : > { %v727_v21 = vmax.f32 %v691_v19, 0.0  ;;  %v739_v22 = vpack.c.bf16 %v729_v18, %v728_v15  ;;  %v712_v23 = vadd.f32 %v1377_v20, %v1229_v46 }
 0x1d0   : > { %v703_v24 = vpop.f32.mrf.mxu1 }
 0x1d1   : > { %v738_v25 = vpack.c.bf16 %v727_v21, %v726_v17  ;;  %v704_v26 = vadd.f32 %v1229_v46, %v703_v24  ;;  %v732_v29 = vmax.f32 %v712_v23, 0.0 }
 0x1d2   : > { %v1378_v27 = vpop.f32.mrf.mxu1 }
 0x1d3   : > { %v715_v28 = vadd.f32 %v1378_v27, %v1229_v46  ;;  %1403 = vmatprep.mubr.bf16.mxu0 %v738_v25  ;;  %v730_v31 = vmax.f32 %v704_v26, 0.0 }
 0x1d4   : > { %v706_v30 = vpop.f32.mrf.mxu1  ;;  %1404 = vmatmul.mubr.bf16.gmra.mxu0 %v739_v22 }
 0x1d5   : > { %v733_v32 = vmax.f32 %v715_v28, 0.0  ;;  %v707_v33 = vadd.f32 %v1229_v46, %v706_v30 }
 0x1d7   : > { %v731_v34 = vmax.f32 %v707_v33, 0.0  ;;  %v741_v35 = vpack.c.bf16 %v733_v32, %v732_v29 }
 0x1d9   : > { %v740_v36 = vpack.c.bf16 %v731_v34, %v730_v31  ;;  %v1247_v34 = vld [vmem:[%s1854_s8] ss:$0 sm:$0xff] }
 0x1db   : > { %1407 = vmatprep.mubr.bf16.mxu0 %v740_v36 }
 0x1dc   : > { %1408 = vmatmul.mubr.bf16.gmra.mxu0 %v741_v35 }
 0x284   : > { %v1397_v40 = vpop.f32.mrf.mxu0 }
 0x285   : > { %v856_v46 = vadd.f32 %v1397_v40, %v1238_v42 }
 0x286   : > { %v847_v41 = vpop.f32.mrf.mxu0 }
 0x287   : > { %v848_v44 = vadd.f32 %v1238_v42, %v847_v41  ;;  %v912_v53 = vmax.f32 %v856_v46, 0.0 }
 0x288   : > { %v1398_v43 = vpop.f32.mrf.mxu0 }
 0x289   : > { %v859_v45 = vadd.f32 %v1398_v43, %v1238_v42  ;;  %v910_v51 = vmax.f32 %v848_v44, 0.0 }
 0x28a   : > { %v850_v47 = vpop.f32.mrf.mxu0 }
 0x28b   : > { %v851_v48 = vadd.f32 %v1238_v42, %v850_v47  ;;  %v913_v49 = vmax.f32 %v859_v45, 0.0 }
 0x28c   : > { %v1401_v50 = vpop.f32.mrf.mxu0 }
 0x28d   : > { %v911_v52 = vmax.f32 %v851_v48, 0.0  ;;  %v927_v56 = vpack.c.bf16 %v913_v49, %v912_v53  ;;  %v872_v60 = vadd.f32 %v1401_v50, %v1238_v42 }
 0x28e   : > { %v863_v54 = vpop.f32.mrf.mxu0 }
 0x28f   : > { %v926_v55 = vpack.c.bf16 %v911_v52, %v910_v51  ;;  %v864_v58 = vadd.f32 %v1238_v42, %v863_v54  ;;  %v916_v3 = vmax.f32 %v872_v60, 0.0 }
 0x290   : > { %v1402_v57 = vpop.f32.mrf.mxu0 }
 0x291   : > { %v875_v59 = vadd.f32 %v1402_v57, %v1238_v42  ;;  %1427 = vmatprep.mubr.bf16.mxu1 %v926_v55  ;;  %v914_v1 = vmax.f32 %v864_v58, 0.0 }
 0x292   : > { %v866_v61 = vpop.f32.mrf.mxu0  ;;  %1428 = vmatmul.mubr.bf16.vlgmr.msra.gmra.mxu1 %v927_v56 }
 0x293   : > { %v867_v62 = vadd.f32 %v1238_v42, %v866_v61  ;;  %v917_v63 = vmax.f32 %v875_v59, 0.0 }
 0x294   : > { %v1405_v0 = vpop.f32.mrf.mxu0 }
 0x295   : > { %v915_v2 = vmax.f32 %v867_v62, 0.0  ;;  %v929_v6 = vpack.c.bf16 %v917_v63, %v916_v3  ;;  %v888_v10 = vadd.f32 %v1405_v0, %v1238_v42 }
 0x296   : > { %v879_v4 = vpop.f32.mrf.mxu0 }
 0x297   : > { %v928_v5 = vpack.c.bf16 %v915_v2, %v914_v1  ;;  %v880_v8 = vadd.f32 %v1238_v42, %v879_v4  ;;  %v920_v17 = vmax.f32 %v888_v10, 0.0 }
 0x298   : > { %v1406_v7 = vpop.f32.mrf.mxu0 }
 0x299   : > { %v891_v9 = vadd.f32 %v1406_v7, %v1238_v42  ;;  %1431 = vmatprep.mubr.bf16.mxu1 %v928_v5  ;;  %v918_v15 = vmax.f32 %v880_v8, 0.0 }
 0x29a   : > { %v882_v11 = vpop.f32.mrf.mxu0  ;;  %1432 = vmatmul.mubr.bf16.gmra.mxu1 %v929_v6 }
 0x29b   : > { %v883_v12 = vadd.f32 %v1238_v42, %v882_v11  ;;  %v921_v13 = vmax.f32 %v891_v9, 0.0 }
 0x29c   : > { %v1409_v14 = vpop.f32.mrf.mxu0 }
 0x29d   : > { %v919_v16 = vmax.f32 %v883_v12, 0.0  ;;  %v904_v18 = vadd.f32 %v1409_v14, %v1238_v42  ;;  %v931_v22 = vpack.c.bf16 %v921_v13, %v920_v17 }
 0x29e   : > { %v895_v19 = vpop.f32.mrf.mxu0 }
 0x29f   : > { %v930_v20 = vpack.c.bf16 %v919_v16, %v918_v15  ;;  %v896_v21 = vadd.f32 %v1238_v42, %v895_v19  ;;  %v924_v25 = vmax.f32 %v904_v18, 0.0 }
 0x2a0   : > { %v1410_v23 = vpop.f32.mrf.mxu0 }
 0x2a1   : > { %v907_v24 = vadd.f32 %v1410_v23, %v1238_v42  ;;  %1435 = vmatprep.mubr.bf16.mxu1 %v930_v20  ;;  %v922_v27 = vmax.f32 %v896_v21, 0.0 }
 0x2a2   : > { %v898_v26 = vpop.f32.mrf.mxu0  ;;  %1436 = vmatmul.mubr.bf16.gmra.mxu1 %v931_v22 }
 0x2a3   : > { %v925_v28 = vmax.f32 %v907_v24, 0.0  ;;  %v899_v29 = vadd.f32 %v1238_v42, %v898_v26 }
 0x2a5   : > { %v923_v30 = vmax.f32 %v899_v29, 0.0  ;;  %v933_v31 = vpack.c.bf16 %v925_v28, %v924_v25 }
 0x2a7   : > { %v932_v32 = vpack.c.bf16 %v923_v30, %v922_v27 }
 0x2a9   : > { %1439 = vmatprep.mubr.bf16.mxu1 %v932_v32 }
 0x2aa   : > { %1440 = vmatmul.mubr.bf16.gmra.mxu1 %v933_v31 }
 0x352   : > { %v1429_v33 = vpop.f32.mrf.mxu1 }
 0x353   : > { %v1048_v41 = vadd.f32 %v1429_v33, %v1247_v34 }
 0x354   : > { %v1039_v35 = vpop.f32.mrf.mxu1 }
 0x355   : > { %v1040_v36 = vadd.f32 %v1247_v34, %v1039_v35 }
 0x356   : > { %v1430_v37 = vpop.f32.mrf.mxu1 }
 0x357   : > { %1102 = vxpose.xlu0.b32.start [1/16] (narrow) %v1040_v36, 8  ;;  %v1051_v43 = vadd.f32 %v1430_v37, %v1247_v34 }
 0x358   : > { %v1042_v38 = vpop.f32.mrf.mxu1 }
 0x359   : > { %v1043_v39 = vadd.f32 %v1247_v34, %v1042_v38 }
 0x35a   : > { %v1433_v40 = vpop.f32.mrf.mxu1 }
 0x35b   : > { %1103 = vxpose.xlu0.b32.cont [2/16] (narrow) %v1043_v39, 8  ;;  %v1064_v49 = vadd.f32 %v1433_v40, %v1247_v34 }
 0x35c   : > { %v1055_v42 = vpop.f32.mrf.mxu1 }
 0x35d   : > { %v1056_v45 = vadd.f32 %v1247_v34, %v1055_v42 }
 0x35e   : > { %v1434_v44 = vpop.f32.mrf.mxu1 }
 0x35f   : > { %1104 = vxpose.xlu0.b32.cont [3/16] (narrow) %v1048_v41, 8  ;;  %v1067_v51 = vadd.f32 %v1434_v44, %v1247_v34 }
 0x360   : > { %v1058_v46 = vpop.f32.mrf.mxu1 }
 0x361   : > { %v1059_v47 = vadd.f32 %v1247_v34, %v1058_v46 }
 0x362   : > { %v1437_v48 = vpop.f32.mrf.mxu1 }
 0x363   : > { %1105 = vxpose.xlu0.b32.cont [4/16] (narrow) %v1051_v43, 8  ;;  %v1080_v57 = vadd.f32 %v1437_v48, %v1247_v34 }
 0x364   : > { %v1071_v50 = vpop.f32.mrf.mxu1 }
 0x365   : > { %v1072_v53 = vadd.f32 %v1247_v34, %v1071_v50 }
 0x366   : > { %v1438_v52 = vpop.f32.mrf.mxu1 }
 0x367   : > { %1106 = vxpose.xlu0.b32.cont [5/16] (narrow) %v1056_v45, 8  ;;  %v1083_v59 = vadd.f32 %v1438_v52, %v1247_v34 }
 0x368   : > { %v1074_v54 = vpop.f32.mrf.mxu1 }
 0x369   : > { %v1075_v55 = vadd.f32 %v1247_v34, %v1074_v54 }
 0x36a   : > { %v1441_v56 = vpop.f32.mrf.mxu1 }
 0x36b   : > { %1107 = vxpose.xlu0.b32.cont [6/16] (narrow) %v1059_v47, 8  ;;  %v1096_v0 = vadd.f32 %v1441_v56, %v1247_v34 }
 0x36c   : > { %v1087_v58 = vpop.f32.mrf.mxu1 }
 0x36d   : > { %v1088_v61 = vadd.f32 %v1247_v34, %v1087_v58 }
 0x36e   : > { %v1442_v60 = vpop.f32.mrf.mxu1 }
 0x36f   : > { %1108 = vxpose.xlu0.b32.cont [7/16] (narrow) %v1064_v49, 8  ;;  %v1099_v1 = vadd.f32 %v1442_v60, %v1247_v34 }
 0x370   : > { %v1090_v62 = vpop.f32.mrf.mxu1 }
 0x371   : > { %v1091_v63 = vadd.f32 %v1247_v34, %v1090_v62 }
 0x373   : > { %1109 = vxpose.xlu0.b32.cont [8/16] (narrow) %v1067_v51, 8 }
 0x377   : > { %1110 = vxpose.xlu0.b32.cont [9/16] (narrow) %v1072_v53, 8 }
 0x37b   : > { %1111 = vxpose.xlu0.b32.cont [10/16] (narrow) %v1075_v55, 8 }
 0x37f   : > { %1112 = vxpose.xlu0.b32.cont [11/16] (narrow) %v1080_v57, 8 }
 0x383   : > { %1113 = vxpose.xlu0.b32.cont [12/16] (narrow) %v1083_v59, 8 }
 0x387   : > { %1114 = vxpose.xlu0.b32.cont [13/16] (narrow) %v1088_v61, 8 }
 0x38b   : > { %1115 = vxpose.xlu0.b32.cont [14/16] (narrow) %v1091_v63, 8 }
 0x38f   : > { %1116 = vxpose.xlu0.b32.cont [15/16] (narrow) %v1096_v0, 8 }
 0x393   : > { %1117 = vxpose.xlu0.b32.end [16/16] (narrow) %v1099_v1, 8 }
 0x3d3   : > { %v1118_v2 = vpop.trf.xlu0 }
 0x3d4   : > { %v1256_v3 = vmul.f32 -1.442695, %v1118_v2 }
 0x3d6   : > { %1512 = vpow2.f32 %v1256_v3 }
 0x3e3   : > { %v1513_v4 = vpop.eup %1512 }
 0x3e4   : > { %v1137_v5 = vadd.f32 1.0, %v1513_v4 }
 0x3e6   : > { %1514 = vrcp.f32 %v1137_v5 }
 0x3f3   : > { %v1515_v6 = vpop.eup %1514 }
 0x3f4   : > { %1140 = vst [vmem:[%s325_s21] sm:$0x1] %v1515_v6 }
 0x3f5   : > { %1529 = shalt.err (!%p1526_p3)
}
 0x3f6   : > { %s1530_s25 = scalar_lea.hbm %s1811_s27, 16  ;;  %s1534_s21 = scalar_lea.hbm %s1855_s9, 32 }
 0x3f7   : > { %p1531_p4 = scmp.ne.s32.totalorder %s1811_s27, %s1530_s25  ;;  %p1535_p9 = scmp.lt.s32.totalorder %s1811_s27, %s1855_s9 }
 0x3f8   : > { %p1536_p10 = scmp.lt.s32.totalorder %s1534_s21, %s1530_s25 }
 0x3f9   : > { %p1532_p7 = pnand %p1531_p4, %p1664_p5 }
 0x3fa   : > { %p1537_p11 = por %p1536_p10, %p1535_p9 }
 0x3fb   : > { %p1533_p8 = pneg %p1532_p7 }
 0x3fd   : > { %p1538_p12 = pnand %p1537_p11, %p1533_p8 }
 0x3ff   : > { %1541 = shalt.err (!%p1538_p12)
}
 0x400   : > { %1444 = dma.vmem_to_hbm [thread:$0]  (%p1664_p5), %s1155_s22, 16, %s1811_s27, %s1142_s28  }
 0x401 PF: > { %p1450_p13 = scmp.ge.s32.totalorder %s1576_s12, 2  ;;  %s1166_s29 = sand.u32 1, %s1564_s30  }
 0x402   : > { %s1167_s26 = scalar_lea.sflag [#allocation3], %s1166_s29 }
 0x403   : > { %p1447_p0 = pnand %p1450_p13, %p1668_p6 }
 0x405   : > { %p1448_p1 = pneg %p1447_p0 }
 0x407   : > { %1559 = dma.done.wait (%p1448_p1), %s1167_s26, 16  }
 0x408   : > { %1561 = vsyncadd (%p1448_p1), %s1167_s26, 4294967280  ;;  %p19_p2 = scmp.ge.s32.totalorder %s1652_s15, 4   ;;  %s1858_s30 = smov %s1568_s10 }
 0x409   : > { %s1859_s10 = smov %s1572_s11  ;;  %s1860_s11 = smov %s1662_s18 }
 0x40a   : > { %s1861_s12 = smov %s1652_s15  ;;  %21 = sbr.rel (!%p19_p2) target bundleno = 3 (0x3), region = 91 }
 0x40f   :  { %1171 = vsyncpa [#allocation3], 1 }
 0x410   :  { %1173 = vsyncpa [#allocation3 + $0x1], 1 }

</bundles_post_ra>
